<compile_context>
chip_gen: v7x
topology: tpu7x:2x2x1
jax: 0.10.0
libtpu: 0.0.40
codegen_flags: <defaults>
</compile_context>

<pallas_src>
import functools

import jax
import jax.numpy as jnp
from jax.experimental import pallas as pl
from jax.experimental.pallas import tpu as pltpu


def _round_up(n, m):
    return ((n + m - 1) // m) * m


def _cdiv(a, b):
    return -(-a // b)


def dqn_kernel(x_ref, w1_ref, b1_ref, w2_ref, b2_ref, w3_ref, b3_ref, o_ref):
    # x_ref: (TB, n_obs) f32; w* bf16; b* f32; o_ref: (TB, N_pad) bf16.
    x = x_ref[...].astype(jnp.bfloat16)

    h1 = jnp.dot(x, w1_ref[...], preferred_element_type=jnp.float32) + b1_ref[...]
    h1 = jnp.maximum(h1, 0.0)

    h2 = jnp.dot(h1.astype(jnp.bfloat16), w2_ref[...],
                 preferred_element_type=jnp.float32) + b2_ref[...]
    h2 = jnp.maximum(h2, 0.0)

    out = jnp.dot(h2.astype(jnp.bfloat16), w3_ref[...],
                  preferred_element_type=jnp.float32) + b3_ref[...]
    o_ref[...] = out.astype(o_ref.dtype)


def prepare_params(params):
    """One-time prep: cast weights to bf16, pad the action dim to a lane-dense 128.

    Returns a dict of ARRAYS ONLY (safe to pass through jit)."""
    w1, b1 = params["w1"], params["b1"]
    w2, b2 = params["w2"], params["b2"]
    w3, b3 = params["w3"], params["b3"]
    hidden = w1.shape[1]
    n_actions = w3.shape[1]
    n_pad = _round_up(n_actions, 128)

    w1p = w1.astype(jnp.bfloat16)                       # (n_obs, hidden), unpadded K
    w2p = w2.astype(jnp.bfloat16)                       # (hidden, hidden)
    w3p = jnp.zeros((hidden, n_pad), jnp.bfloat16).at[:, :n_actions].set(
        w3.astype(jnp.bfloat16))                        # (hidden, n_pad)
    b1p = b1.astype(jnp.float32).reshape(1, hidden)
    b2p = b2.astype(jnp.float32).reshape(1, hidden)
    b3p = jnp.zeros((1, n_pad), jnp.float32).at[:, :n_actions].set(
        b3.astype(jnp.float32).reshape(1, n_actions))
    return {"w1": w1p, "b1": b1p, "w2": w2p, "b2": b2p, "w3": w3p, "b3": b3p}


@functools.partial(jax.jit, static_argnames=("n_actions", "block_b"))
def dqn_forward(x, params, *, n_actions, block_b=2048):
    """x: (B, n_observations) float32. Returns (B, n_actions) float32."""
    B, n_obs = x.shape
    w1, b1 = params["w1"], params["b1"]
    w2, b2 = params["w2"], params["b2"]
    w3, b3 = params["w3"], params["b3"]
    hidden = w1.shape[1]
    n_pad = w3.shape[1]

    # ---- batch tiling: minimize ragged waste, ensure >=2 steps for big batches ----
    b8 = _round_up(B, 8)
    cap = max(8, _round_up(min(block_b, 4096), 8))
    num_tiles = max(1, _cdiv(b8, cap))
    if num_tiles == 1 and b8 >= 1024:
        num_tiles = 2          # let both v7x TensorCores get a grid step
    tb = _round_up(_cdiv(b8, num_tiles), 8)
    b_pad = tb * num_tiles

    # Only pad batch rows (tiny, n_obs cols) — no (B,128) bf16 round trip through HBM.
    xp = jnp.pad(x, ((0, b_pad - B), (0, 0)))

    resident = lambda shape: pl.BlockSpec(shape, lambda i: (0, 0))
    out = pl.pallas_call(
        dqn_kernel,
        out_shape=jax.ShapeDtypeStruct((b_pad, n_pad), jnp.bfloat16),
        grid=(b_pad // tb,),
        in_specs=[
            pl.BlockSpec((tb, n_obs), lambda i: (i, 0)),   # x: tiled over batch
            resident((n_obs, hidden)), resident((1, hidden)),   # w1, b1 (VMEM-resident)
            resident((hidden, hidden)), resident((1, hidden)),  # w2, b2
            resident((hidden, n_pad)), resident((1, n_pad)),    # w3, b3
        ],
        out_specs=pl.BlockSpec((tb, n_pad), lambda i: (i, 0)),
        compiler_params=pltpu.CompilerParams(
            dimension_semantics=("parallel",)),
    )(xp, w1, b1, w2, b2, w3, b3)

    # Padded action lanes are exactly zero and are sliced off here; cast tiny result to f32.
    return out[:B, :n_actions].astype(jnp.float32)


def init_params(key, n_observations, n_actions, hidden_size=128):
    """PyTorch nn.Linear-style init: U(-1/sqrt(fan_in), 1/sqrt(fan_in))."""
    keys = jax.random.split(key, 6)

    def linear(kw, kb, fan_in, fan_out):
        bound = 1.0 / jnp.sqrt(jnp.float32(fan_in))
        w = jax.random.uniform(kw, (fan_in, fan_out), jnp.float32, -bound, bound)
        b = jax.random.uniform(kb, (1, fan_out), jnp.float32, -bound, bound)
        return w, b

    w1, b1 = linear(keys[0], keys[1], n_observations, hidden_size)
    w2, b2 = linear(keys[2], keys[3], hidden_size, hidden_size)
    w3, b3 = linear(keys[4], keys[5], hidden_size, n_actions)
    return {"w1": w1, "b1": b1, "w2": w2, "b2": b2, "w3": w3, "b3": b3}


def dqn_reference_f32(x, params):
    h1 = jnp.maximum(x @ params["w1"] + params["b1"], 0.0)
    h2 = jnp.maximum(h1 @ params["w2"] + params["b2"], 0.0)
    return h2 @ params["w3"] + params["b3"]


def dqn_reference_bf16(x, params):
    bf = jnp.bfloat16
    h1 = jnp.dot(x.astype(bf), params["w1"].astype(bf),
                 preferred_element_type=jnp.float32) + params["b1"]
    h1 = jnp.maximum(h1, 0.0)
    h2 = jnp.dot(h1.astype(bf), params["w2"].astype(bf),
                 preferred_element_type=jnp.float32) + params["b2"]
    h2 = jnp.maximum(h2, 0.0)
    return jnp.dot(h2.astype(bf), params["w3"].astype(bf),
                   preferred_element_type=jnp.float32) + params["b3"]


if __name__ == "__main__":
    key = jax.random.PRNGKey(0)
    k_param, k_x1, k_x2 = jax.random.split(key, 3)

    n_observations = 4   # e.g. CartPole observation dim
    n_actions = 2        # e.g. CartPole action dim

    params = init_params(k_param, n_observations, n_actions)
    prep = prepare_params(params)

    # Small inference-style batch (single grid step).
    x_small = jax.random.normal(k_x1, (2, n_observations), jnp.float32)
    out_small = jax.block_until_ready(
        dqn_forward(x_small, prep, n_actions=n_actions))
    assert out_small.shape == (2, n_actions)
    assert jnp.allclose(out_small, dqn_reference_bf16(x_small, params),
                        atol=2e-2, rtol=2e-2), "mismatch vs bf16 reference (small)"
    assert jnp.allclose(out_small, dqn_reference_f32(x_small, params),
                        atol=5e-2, rtol=5e-2), "mismatch vs f32 reference (small)"

    # Training-style batch exercising multiple grid tiles + batch padding.
    x_big = jax.random.normal(k_x2, (300, n_observations), jnp.float32)
    out_big = jax.block_until_ready(
        dqn_forward(x_big, prep, n_actions=n_actions, block_b=128))
    assert out_big.shape == (300, n_actions)
    assert jnp.allclose(out_big, dqn_reference_bf16(x_big, params),
                        atol=2e-2, rtol=2e-2), "mismatch vs bf16 reference (tiled)"
    assert jnp.allclose(out_big, dqn_reference_f32(x_big, params),
                        atol=5e-2, rtol=5e-2), "mismatch vs f32 reference (tiled)"

    print("KERNEL_OK")
</pallas_src>

<mosaic_0001>
module attributes {stable_mosaic.version = 11 : i64} {
  func.func @dqn_kernel(%arg0: i32, %arg1: memref<8x4xf32, #tpu.memory_space<vmem>>, %arg2: memref<4x128xbf16, #tpu.memory_space<vmem>>, %arg3: memref<1x128xf32, #tpu.memory_space<vmem>>, %arg4: memref<128x128xbf16, #tpu.memory_space<vmem>>, %arg5: memref<1x128xf32, #tpu.memory_space<vmem>>, %arg6: memref<128x128xbf16, #tpu.memory_space<vmem>>, %arg7: memref<1x128xf32, #tpu.memory_space<vmem>>, %arg8: memref<8x128xbf16, #tpu.memory_space<vmem>>) attributes {dimension_semantics = [#tpu.dimension_semantics<parallel>], iteration_bounds = array<i64: 1>, scalar_prefetch = 0 : i64, scratch_operands = 0 : i64, tpu.core_type = #tpu.core_type<tc>, window_params = [{transform_indices = @transform_0, window_bounds = array<i64: 8, 4>}, {pipeline_mode = #tpu.pipeline_mode<synchronous>, transform_indices = @transform_1, window_bounds = array<i64: 4, 128>}, {pipeline_mode = #tpu.pipeline_mode<synchronous>, transform_indices = @transform_2, window_bounds = array<i64: 1, 128>}, {pipeline_mode = #tpu.pipeline_mode<synchronous>, transform_indices = @transform_3, window_bounds = array<i64: 128, 128>}, {pipeline_mode = #tpu.pipeline_mode<synchronous>, transform_indices = @transform_4, window_bounds = array<i64: 1, 128>}, {pipeline_mode = #tpu.pipeline_mode<synchronous>, transform_indices = @transform_5, window_bounds = array<i64: 128, 128>}, {pipeline_mode = #tpu.pipeline_mode<synchronous>, transform_indices = @transform_6, window_bounds = array<i64: 1, 128>}, {transform_indices = @transform_7, window_bounds = array<i64: 8, 128>}]} {
    %c0 = arith.constant 0 : index
    %c0_0 = arith.constant 0 : index
    %0 = vector.load %arg1[%c0, %c0_0] : memref<8x4xf32, #tpu.memory_space<vmem>>, vector<8x4xf32>
    %1 = arith.truncf %0 : vector<8x4xf32> to vector<8x4xbf16>
    %c0_1 = arith.constant 0 : index
    %c0_2 = arith.constant 0 : index
    %2 = vector.load %arg2[%c0_1, %c0_2] : memref<4x128xbf16, #tpu.memory_space<vmem>>, vector<4x128xbf16>
    %cst = arith.constant dense<0.000000e+00> : vector<8x128xf32>
    %3 = tpu.matmul %1, %2, %cst {dimension_numbers = #tpu.dot_dimension_numbers<[1], [0], [0], [1], [0, 0, 1, 1], [], []>} : vector<8x4xbf16>, vector<4x128xbf16>, vector<8x128xf32> -> vector<8x128xf32>
    %c0_3 = arith.constant 0 : index
    %c0_4 = arith.constant 0 : index
    %4 = vector.load %arg3[%c0_3, %c0_4] : memref<1x128xf32, #tpu.memory_space<vmem>>, vector<1x128xf32>
    %5 = vector.broadcast %4 : vector<1x128xf32> to vector<8x128xf32>
    %6 = arith.addf %3, %5 : vector<8x128xf32>
    %cst_5 = arith.constant 0.000000e+00 : f32
    %7 = vector.broadcast %cst_5 : f32 to vector<8x128xf32>
    %8 = arith.maximumf %6, %7 : vector<8x128xf32>
    %9 = arith.truncf %8 : vector<8x128xf32> to vector<8x128xbf16>
    %c0_6 = arith.constant 0 : index
    %c0_7 = arith.constant 0 : index
    %10 = vector.load %arg4[%c0_6, %c0_7] : memref<128x128xbf16, #tpu.memory_space<vmem>>, vector<128x128xbf16>
    %cst_8 = arith.constant dense<0.000000e+00> : vector<8x128xf32>
    %11 = tpu.matmul %9, %10, %cst_8 {dimension_numbers = #tpu.dot_dimension_numbers<[1], [0], [0], [1], [0, 0, 1, 1], [], []>} : vector<8x128xbf16>, vector<128x128xbf16>, vector<8x128xf32> -> vector<8x128xf32>
    %c0_9 = arith.constant 0 : index
    %c0_10 = arith.constant 0 : index
    %12 = vector.load %arg5[%c0_9, %c0_10] : memref<1x128xf32, #tpu.memory_space<vmem>>, vector<1x128xf32>
    %13 = vector.broadcast %12 : vector<1x128xf32> to vector<8x128xf32>
    %14 = arith.addf %11, %13 : vector<8x128xf32>
    %cst_11 = arith.constant 0.000000e+00 : f32
    %15 = vector.broadcast %cst_11 : f32 to vector<8x128xf32>
    %16 = arith.maximumf %14, %15 : vector<8x128xf32>
    %17 = arith.truncf %16 : vector<8x128xf32> to vector<8x128xbf16>
    %c0_12 = arith.constant 0 : index
    %c0_13 = arith.constant 0 : index
    %18 = vector.load %arg6[%c0_12, %c0_13] : memref<128x128xbf16, #tpu.memory_space<vmem>>, vector<128x128xbf16>
    %cst_14 = arith.constant dense<0.000000e+00> : vector<8x128xf32>
    %19 = tpu.matmul %17, %18, %cst_14 {dimension_numbers = #tpu.dot_dimension_numbers<[1], [0], [0], [1], [0, 0, 1, 1], [], []>} : vector<8x128xbf16>, vector<128x128xbf16>, vector<8x128xf32> -> vector<8x128xf32>
    %c0_15 = arith.constant 0 : index
    %c0_16 = arith.constant 0 : index
    %20 = vector.load %arg7[%c0_15, %c0_16] : memref<1x128xf32, #tpu.memory_space<vmem>>, vector<1x128xf32>
    %21 = vector.broadcast %20 : vector<1x128xf32> to vector<8x128xf32>
    %22 = arith.addf %19, %21 : vector<8x128xf32>
    %23 = arith.truncf %22 : vector<8x128xf32> to vector<8x128xbf16>
    %c0_17 = arith.constant 0 : index
    %c0_18 = arith.constant 0 : index
    %24 = vector.load %arg8[%c0_17, %c0_18] : memref<8x128xbf16, #tpu.memory_space<vmem>>, vector<8x128xbf16>
    tpu.vector_store %arg8[%c0_17, %c0_18], %23 {strides = array<i32>} : memref<8x128xbf16, #tpu.memory_space<vmem>>, vector<8x128xbf16>,
    return
  }
  func.func @transform_0(%arg0: i32) -> (i32, i32) {
    %c0_i32 = arith.constant 0 : i32
    %c0_i32_0 = arith.constant 0 : i32
    return %arg0, %c0_i32 : i32, i32
  }
  func.func @transform_1(%arg0: i32) -> (i32, i32) {
    %c0_i32 = arith.constant 0 : i32
    %c0_i32_0 = arith.constant 0 : i32
    %c0_i32_1 = arith.constant 0 : i32
    return %c0_i32, %c0_i32_0 : i32, i32
  }
  func.func @transform_2(%arg0: i32) -> (i32, i32) {
    %c0_i32 = arith.constant 0 : i32
    %c0_i32_0 = arith.constant 0 : i32
    %c0_i32_1 = arith.constant 0 : i32
    return %c0_i32, %c0_i32_0 : i32, i32
  }
  func.func @transform_3(%arg0: i32) -> (i32, i32) {
    %c0_i32 = arith.constant 0 : i32
    %c0_i32_0 = arith.constant 0 : i32
    %c0_i32_1 = arith.constant 0 : i32
    return %c0_i32, %c0_i32_0 : i32, i32
  }
  func.func @transform_4(%arg0: i32) -> (i32, i32) {
    %c0_i32 = arith.constant 0 : i32
    %c0_i32_0 = arith.constant 0 : i32
    %c0_i32_1 = arith.constant 0 : i32
    return %c0_i32, %c0_i32_0 : i32, i32
  }
  func.func @transform_5(%arg0: i32) -> (i32, i32) {
    %c0_i32 = arith.constant 0 : i32
    %c0_i32_0 = arith.constant 0 : i32
    %c0_i32_1 = arith.constant 0 : i32
    return %c0_i32, %c0_i32_0 : i32, i32
  }
  func.func @transform_6(%arg0: i32) -> (i32, i32) {
    %c0_i32 = arith.constant 0 : i32
    %c0_i32_0 = arith.constant 0 : i32
    %c0_i32_1 = arith.constant 0 : i32
    return %c0_i32, %c0_i32_0 : i32, i32
  }
  func.func @transform_7(%arg0: i32) -> (i32, i32) {
    %c0_i32 = arith.constant 0 : i32
    %c0_i32_0 = arith.constant 0 : i32
    return %arg0, %c0_i32 : i32, i32
  }
}

</mosaic_0001>

<bundles_post_ra>
// kernel: dqn_forward.1
= control target key start
LH: loop header
LB: loop body
LE: loop exit
PB: predicated region body
PF: predicated region fallthrough
CT: control target
= control target key end

     0   :  { %12 = vsyncpa [#allocation3], 0  ;;  %s614_s0 = inlined_call_operand.vmem [shape: f32[8,4], index: 0, kind: input, shape index: {}]   ;;  %s615_s1 = inlined_call_operand.vmem [shape: bf16[4,128], index: 1, kind: input, shape index: {}]   ;;  %s616_s2 = inlined_call_operand.vmem [shape: f32[1,128], index: 2, kind: input, shape index: {}]   ;;  %s617_s3 = inlined_call_operand.hbm [shape: bf16[128,128], index: 3, kind: input, shape index: {}]   ;;  %s618_s4 = inlined_call_operand.vmem [shape: f32[1,128], index: 4, kind: input, shape index: {}]   ;;  %s619_s5 = inlined_call_operand.hbm [shape: bf16[128,128], index: 5, kind: input, shape index: {}]   ;;  %s620_s6 = inlined_call_operand.vmem [shape: f32[1,128], index: 6, kind: input, shape index: {}]   ;;  %s621_s7 = inlined_call_operand.vmem [shape: bf16[8,128], index: 7, kind: output, shape index: {}]  }
   0x1   :  { %13 = vsyncpa [#allocation5], 0  ;;  %s503_s24 = smov [#allocation2]   ;;  %s455_s28 = scalar_lea.hbm %s617_s3, 1024 }
   0x2   :  { %s25_s25 = sshll.u32 %s503_s24, 4  ;;  %p456_p0 = scmp.ne.s32.totalorder %s617_s3, %s455_s28  ;;  %s26_s25 = int_to_ptr.vmem [resolvable:$true] %s25_s25 }
   0x3   :  { %p459_p1 = scmp.lt.u32.totalorder %s455_s28, %s617_s3 }
   0x5   :  { %p461_p2 = pnand %p459_p1, %p456_p0 }
   0x7   :  { %464 = shalt.err (!%p461_p2)
}
   0x8   :  { %s465_s10 = scalar_lea.vmem %s26_s25, 1024  ;;  %p470_p4 = scmp.lt.s32.totalorder %s26_s25, %s26_s25 }
   0x9   :  { %p466_p3 = scmp.ne.s32.totalorder %s26_s25, %s465_s10  ;;  %p471_p5 = scmp.lt.s32.totalorder %s465_s10, %s465_s10 }
   0xb   :  { %p472_p6 = por %p471_p5, %p470_p4 }
   0xd   :  { %p473_p7 = pnand %p472_p6, %p466_p3 }
   0xf   :  { %476 = shalt.err (!%p473_p7)
}
  0x10   :  { %s504_s11 = smov 64   ;;  %s505_s12 = smov 4  }
  0x11   :  { %31 = dma.hbm_to_vmem [thread:$0]  %s617_s3, 1024, %s26_s25, [#allocation3], %s504_s11, %s504_s11, %s505_s12  }
  0x12   :  { %s506_s15 = smov [#allocation4]   ;;  %s477_s19 = scalar_lea.hbm %s619_s5, 1024 }
  0x13   :  { %s39_s16 = sshll.u32 %s506_s15, 4  ;;  %p478_p8 = scmp.ne.s32.totalorder %s619_s5, %s477_s19  ;;  %s40_s16 = int_to_ptr.vmem [resolvable:$true] %s39_s16 }
  0x14   :  { %p481_p9 = scmp.lt.u32.totalorder %s477_s19, %s619_s5 }
  0x16   :  { %p483_p10 = pnand %p481_p9, %p478_p8 }
  0x18   :  { %486 = shalt.err (!%p483_p10)
}
  0x19   :  { %s487_s24 = scalar_lea.vmem %s40_s16, 1024  ;;  %p492_p12 = scmp.lt.s32.totalorder %s40_s16, %s40_s16 }
  0x1a   :  { %p488_p11 = scmp.ne.s32.totalorder %s40_s16, %s487_s24  ;;  %p493_p13 = scmp.lt.s32.totalorder %s487_s24, %s487_s24 }
  0x1c   :  { %p494_p0 = por %p493_p13, %p492_p12 }
  0x1e   :  { %p495_p1 = pnand %p494_p0, %p488_p11 }
  0x20   :  { %498 = shalt.err (!%p495_p1)
}
  0x21   :  { %45 = dma.hbm_to_vmem [thread:$0]  %s619_s5, 1024, %s40_s16, [#allocation5], %s504_s11, %s504_s11, %s505_s12  }
  0x22   :  { %499 = dma.done.wait [#allocation3], 1024  }
  0x23   :  { %500 = vsyncadd [#allocation3], 4294966272 }
  0x24   :  { %501 = dma.done.wait [#allocation5], 1024  }
  0x25   :  { %502 = vsyncadd [#allocation5], 4294966272  ;;  %v507_v0 = vmov 0.0   ;;  %vm508_vm0 = vmmov 0   ;;  %vm69_vm1 = vcmask 1041408   ;;  %v55_v2 = vld [vmem:[%s614_s0] sm:$0xff] }
  0x26   :  { %387 = vmatprep.subr.bf16.mxu0 %v507_v0  ;;  %389 = vmatprep.mubr.msk.bf16.mxu0 %vm508_vm0, %v507_v0  ;;  %v57_v1 = vld [vmem:[%s615_s1] sm:$0x3]  ;;  %v56_v4 = vpack.c.bf16 %v55_v2, %v55_v2  ;;  %vm65_vm2 = vcmask 31744   ;;  %v440_v6 = vld [vmem:[#allocation2 + $0x8] sm:$0xff]   ;;  %v441_v7 = vld [vmem:[#allocation2 + $0x10] sm:$0xff]  }
  0x27   :  { %393 = vmatprep.subr.bf16.mxu1 %v507_v0  ;;  %409 = vmatprep.mubr.msk.bf16.mxu1 %vm508_vm0, %v507_v0  ;;  %v71_v3 = vsel %vm69_vm1, %v57_v1, 0  ;;  %v439_v5 = vld [vmem:[#allocation2] sm:$0xff]   ;;  %v442_v8 = vld [vmem:[#allocation2 + $0x18] sm:$0xff]   ;;  %v444_v10 = vld [vmem:[#allocation2 + $0x28] sm:$0xff]  }
  0x28   :  { %388 = vmatpush3.bf16.msra.mxu0 %v71_v3  ;;  %394 = vmatpush3.bf16.msra.mxu1 %v439_v5  ;;  %v443_v9 = vld [vmem:[#allocation2 + $0x20] sm:$0xff]   ;;  %v445_v11 = vld [vmem:[#allocation2 + $0x30] sm:$0xff]   ;;  %v446_v12 = vld [vmem:[#allocation2 + $0x38] sm:$0xff]  }
  0x29   :  { %413 = vmatprep.subr.bf16.mxu0 %v507_v0  ;;  %395 = vmatprep.subr.bf16.mxu1 %v507_v0  ;;  %v447_v13 = vld [vmem:[#allocation4] sm:$0xff]   ;;  %v448_v14 = vld [vmem:[#allocation4 + $0x8] sm:$0xff]   ;;  %v449_v15 = vld [vmem:[#allocation4 + $0x10] sm:$0xff]  }
  0x2a   :  { %v450_v16 = vld [vmem:[#allocation4 + $0x18] sm:$0xff]   ;;  %v451_v17 = vld [vmem:[#allocation4 + $0x20] sm:$0xff]   ;;  %v452_v18 = vld [vmem:[#allocation4 + $0x28] sm:$0xff]  }
  0x2b   :  { %390 = vmatmul.mubr.msk.bf16.vlgmr.msra.gmra.mrb[0].mxu0 %vm65_vm2, %v56_v4  ;;  %v347_v19 = vld [vmem:[%s616_s2] ss:$0 sm:$0xff]  ;;  %v453_v27 = vld [vmem:[#allocation4 + $0x30] sm:$0xff]   ;;  %v454_v28 = vld [vmem:[#allocation4 + $0x38] sm:$0xff]  }
  0x2c   :  { %429 = vmatprep.mubr.msk.bf16.mxu0 %vm508_vm0, %v507_v0  ;;  %396 = vmatpush3.bf16.msra.mxu1 %v440_v6  ;;  %v349_v29 = vld [vmem:[%s618_s4] ss:$0 sm:$0xff] }
  0x2d   :  { %397 = vmatprep.subr.bf16.mxu1 %v507_v0  ;;  %414 = vmatpush3.bf16.msra.mxu0 %v447_v13  ;;  %v358_v37 = vld [vmem:[%s620_s6] ss:$0 sm:$0xff] }
  0x2e   :  { %415 = vmatprep.subr.bf16.mxu0 %v507_v0 }
  0x30   :  { %398 = vmatpush3.bf16.msra.mxu1 %v441_v7 }
  0x31   :  { %399 = vmatprep.subr.bf16.mxu1 %v507_v0  ;;  %416 = vmatpush3.bf16.msra.mxu0 %v448_v14 }
  0x32   :  { %417 = vmatprep.subr.bf16.mxu0 %v507_v0 }
  0x34   :  { %400 = vmatpush3.bf16.msra.mxu1 %v442_v8 }
  0x35   :  { %401 = vmatprep.subr.bf16.mxu1 %v507_v0  ;;  %418 = vmatpush3.bf16.msra.mxu0 %v449_v15 }
  0x36   :  { %419 = vmatprep.subr.bf16.mxu0 %v507_v0 }
  0x38   :  { %402 = vmatpush3.bf16.msra.mxu1 %v443_v9 }
  0x39   :  { %403 = vmatprep.subr.bf16.mxu1 %v507_v0  ;;  %420 = vmatpush3.bf16.msra.mxu0 %v450_v16 }
  0x3a   :  { %421 = vmatprep.subr.bf16.mxu0 %v507_v0 }
  0x3c   :  { %404 = vmatpush3.bf16.msra.mxu1 %v444_v10 }
  0x3d   :  { %405 = vmatprep.subr.bf16.mxu1 %v507_v0  ;;  %422 = vmatpush3.bf16.msra.mxu0 %v451_v17 }
  0x3e   :  { %423 = vmatprep.subr.bf16.mxu0 %v507_v0 }
  0x40   :  { %406 = vmatpush3.bf16.msra.mxu1 %v445_v11 }
  0x41   :  { %407 = vmatprep.subr.bf16.mxu1 %v507_v0  ;;  %424 = vmatpush3.bf16.msra.mxu0 %v452_v18 }
  0x42   :  { %425 = vmatprep.subr.bf16.mxu0 %v507_v0 }
  0x44   :  { %408 = vmatpush3.bf16.msra.mxu1 %v446_v12 }
  0x45   :  { %426 = vmatpush3.bf16.msra.mxu0 %v453_v27 }
  0x46   :  { %427 = vmatprep.subr.bf16.mxu0 %v507_v0 }
  0x49   :  { %428 = vmatpush3.bf16.msra.mxu0 %v454_v28 }
  0xfe   :  { %v107_v20 = vpop.f32.mrb[0].mxu0 }
  0xff   :  { %v108_v21 = vadd.f32 %v347_v19, %v107_v20  ;;  %v391_v22 = vpop.f32.mrb[1].mxu0 }
 0x100   :  { %v110_v23 = vpop.f32.mrb[2].mxu0 }
 0x101   :  { %v113_v24 = vmax.f32 %v108_v21, 0.0  ;;  %v392_v25 = vpop.f32.mrb[3].mxu0 }
 0x103   :  { %v114_v26 = vpack.c.bf16 %v113_v24, %v113_v24 }
 0x105   :  { %410 = vmatmul.mubr.bf16.vlgmr.msra.gmra.mrb[0].mxu1 %v114_v26 }
 0x1d8   :  { %v220_v30 = vpop.f32.mrb[0].mxu1 }
 0x1d9   :  { %v221_v31 = vadd.f32 %v349_v29, %v220_v30  ;;  %v411_v32 = vpop.f32.mrb[1].mxu1 }
 0x1da   :  { %v223_v33 = vpop.f32.mrb[2].mxu1 }
 0x1db   :  { %v226_v34 = vmax.f32 %v221_v31, 0.0  ;;  %v412_v35 = vpop.f32.mrb[3].mxu1 }
 0x1dd   :  { %v227_v36 = vpack.c.bf16 %v226_v34, %v226_v34 }
 0x1df   :  { %430 = vmatmul.mubr.bf16.vlgmr.msra.gmra.mrb[4].mxu0 %v227_v36 }
 0x2b2   :  { %v333_v38 = vpop.f32.mrb[4].mxu0 }
 0x2b3   :  { %v334_v39 = vadd.f32 %v358_v37, %v333_v38  ;;  %v431_v40 = vpop.f32.mrb[5].mxu0 }
 0x2b4   :  { %v336_v41 = vpop.f32.mrb[6].mxu0 }
 0x2b5   :  { %v339_v42 = vpack.c.bf16 %v334_v39, %v334_v39  ;;  %v432_v43 = vpop.f32.mrb[7].mxu0 }
 0x2b7   :  { %340 = vst [vmem:[%s621_s7] sm:$0xf] %v339_v42 }
 0x2b8   :  { %345 = vsyncpa [#allocation3], 1 }
 0x2b9   :  { %346 = vsyncpa [#allocation5], 1 }

</bundles_post_ra>
